<compile_context>
chip_gen: v7x
topology: tpu7x:2x2x1
jax: 0.10.0
libtpu: 0.0.40
codegen_flags: <defaults>
</compile_context>

<pallas_src>
import math

import jax
import jax.numpy as jnp
from jax.experimental import pallas as pl
from jax.experimental.pallas import tpu as pltpu


# --------------------------------------------------------------------------- #
# Kernels
# --------------------------------------------------------------------------- #
def _conv_bn_relu_pool_kernel(x_ref, w_ref, b_ref, p_ref, o_ref):
    # x_ref: (1, Cin, S)     w_ref: (Cout, Cin) [mxu dtype]   b_ref: (Cout, 1) f32
    # p_ref: (S, So) [mxu dtype]                              o_ref: (1, Cout, So)
    x = x_ref[0]
    if x.dtype != w_ref.dtype:
        x = x.astype(w_ref.dtype)            # in-kernel cast: no extra HBM traffic
    y = jnp.dot(w_ref[...], x, preferred_element_type=jnp.float32)
    y = jnp.maximum(y + b_ref[...], 0.0)     # f32 epilogue (bias + ReLU)
    y = y.astype(p_ref.dtype)                # bf16 -> native-rate MXU pool matmul
    pooled = jnp.dot(y, p_ref[...], preferred_element_type=jnp.float32)
    o_ref[0] = pooled.astype(o_ref.dtype)    # lane-dense store


def _conv_bn_relu_kernel(x_ref, w_ref, b_ref, o_ref):
    x = x_ref[0]
    if x.dtype != w_ref.dtype:
        x = x.astype(w_ref.dtype)
    y = jnp.dot(w_ref[...], x, preferred_element_type=jnp.float32)
    y = jnp.maximum(y + b_ref[...], 0.0)
    o_ref[0] = y.astype(o_ref.dtype)


# --------------------------------------------------------------------------- #
# Helpers
# --------------------------------------------------------------------------- #
def _round_up(x, m):
    return -(-x // m) * m


def _vmem_capacity_bytes():
    try:
        info = pltpu.get_tpu_info()
        cap = getattr(info, "vmem_capacity_bytes", None)
        if cap:
            return int(cap)
    except Exception:
        pass
    return 64 << 20            # conservative default (v7x physical VMEM)


def _const_spec(block_shape, index_map):
    """BlockSpec for a grid-invariant operand; single-buffer it when supported."""
    try:
        return pl.BlockSpec(block_shape, index_map, pipeline_mode=pl.Buffered(1))
    except Exception:          # older BlockSpec without pipeline_mode / Buffered(1)
        return pl.BlockSpec(block_shape, index_map)


def _pool_matrix(th, wp, w_real, tho, wop, wo_real, dtype):
    """(th*wp, tho*wop) matrix: 0.25 iff input pixel (h, w) lies in the 2x2 window
    of output pixel (ho, wo), with zero rows for padded input columns (w >= w_real)
    and zero columns for padded output columns (wo >= wo_real)."""
    hi = jnp.arange(th)
    wi = jnp.arange(wp)
    hoi = jnp.arange(tho)
    woi = jnp.arange(wop)
    mh = (hi[:, None] // 2) == hoi[None, :]                           # (th, tho)
    mw = (((wi[:, None] // 2) == woi[None, :])
          & (wi[:, None] < w_real) & (woi[None, :] < wo_real))        # (wp, wop)
    p = mh[:, None, :, None] & mw[None, :, None, :]                   # (th,wp,tho,wop)
    return (p.reshape(th * wp, tho * wop).astype(jnp.float32) * 0.25).astype(dtype)


def _vmem_estimate(cin, cout, s, so, in_item, out_item, mxu_item, with_pooling):
    """Per-grid-step VMEM working set: x (x2), f32 intermediate y, weight/bias (x2),
    output (x2) and (if pooling) the pool matrix counted double-buffered."""
    est = 2 * cin * s * in_item
    est += cout * s * 4
    est += 2 * cout * cin * mxu_item + 2 * cout * 4
    est += 2 * cout * so * out_item
    if with_pooling:
        est += 2 * s * so * mxu_item
    return int(est)


def _plan_pooled(h2, w2, cin, cout, in_item, out_item, mxu_item, n_batch, vmem_cap):
    """Pick (th, wp, wop): row tile th (even, divides h2) and padded widths so that
    th*wp and (th//2)*wop are 128-multiples (lane-dense blocks / stores)."""
    wo = w2 // 2
    ho = h2 // 2
    max_lanes = max(512, _round_up(4 * cin, 512))   # pool-matmul FLOPs <= conv FLOPs
    vmem_budget = int(0.55 * vmem_cap)

    def fits(s, so):
        return _vmem_estimate(cin, cout, s, so, in_item, out_item, mxu_item,
                              True) <= vmem_budget

    # Whole image per step: always layout-legal (block dims == full dims), no pad.
    full = (h2, w2, wo)
    if h2 * w2 <= max_lanes and fits(h2 * w2, ho * wo):
        return full

    cands = []
    for th in range(2, h2 + 1, 2):
        if h2 % th:
            continue
        tho = th // 2
        wp = _round_up(w2, 128 // math.gcd(th, 128))
        wop = _round_up(wo, 128 // math.gcd(tho, 128))
        s, so = th * wp, tho * wop
        if not fits(s, so):
            continue
        cands.append((th, wp, wop, s, so))
    if not cands:
        return full                                   # tiny / degenerate shapes

    capped = [c for c in cands if c[3] <= max_lanes] or cands
    efficient = [c for c in capped if c[3] >= 512] or capped

    def key(c):
        th, wp, wop, s, so = c
        tho = th // 2
        ideal = cin * th * w2 + th * w2 * tho * wo    # un-padded MXU work / tile
        ratio = (cin * s + s * so) / max(ideal, 1)    # padding overhead factor
        return (int(round(ratio * 8)), th)            # least overhead, then smallest TH

    best = min(efficient, key=key)
    return best[0], best[1], best[2]


def _plan_flat(l, cin, cout, in_item, out_item, mxu_item, n_batch, vmem_cap):
    """No-pool path (HBM-bound): pick (tile_lanes, padded_len) with big blocks."""
    per_lane = 2 * cin * in_item + 2 * cout * out_item + cout * 4
    budget = int(0.5 * vmem_cap) - 2 * cout * cin * mxu_item - (2 << 20)
    t_cap = max(128, min(budget // per_lane, 32768) // 128 * 128)
    k = max(-(-l // t_cap), 1)
    if n_batch * k < 2 and l >= 1024:
        k = max(k, 2)             # keep grid megacore-splittable / pipelined at N=1
    if k <= 1:
        return l, l               # single full-extent block: always legal, no pad
    t = _round_up(-(-l // k), 128)
    return t, k * t


# --------------------------------------------------------------------------- #
# Wrapper
# --------------------------------------------------------------------------- #
def transition_block(x_nchw, w, gamma, beta, run_mean, run_var,
                     *, with_pooling=True, eps=1e-5, use_bf16_matmul=True):
    """PeleeNet TransitionBlock forward.  x_nchw: (N, Cin, H, W).
    w: (Cout, Cin) or (Cout, Cin, 1, 1) 1x1-conv weight.  Eval-mode BN.  NCHW out."""
    n, cin, h, width = x_nchw.shape
    w_mat = jnp.reshape(w, (w.shape[0], cin))
    cout = w_mat.shape[0]
    in_dtype = x_nchw.dtype
    in_item = jnp.dtype(in_dtype).itemsize
    out_item = in_item

    # MXU operand dtype: native bf16 vs MXU-emulated f32xf32 (~3-6x faster).
    mxu_dtype = jnp.bfloat16 if (use_bf16_matmul and in_dtype == jnp.float32) else in_dtype
    mxu_item = jnp.dtype(mxu_dtype).itemsize

    # Fold BN into per-out-channel scale (into the weight) and bias.
    scale = gamma.astype(jnp.float32) / jnp.sqrt(run_var.astype(jnp.float32) + eps)
    bias = beta.astype(jnp.float32) - run_mean.astype(jnp.float32) * scale
    w_scaled = (w_mat.astype(jnp.float32) * scale[:, None]).astype(mxu_dtype)
    bias2 = bias.reshape(cout, 1)                    # stays f32 (epilogue precision)

    vmem_cap = _vmem_capacity_bytes()

    if with_pooling:
        h2, w2d = (h // 2) * 2, (width // 2) * 2     # AvgPool2d(2,2) floor semantics
        ho, wo = h2 // 2, w2d // 2
        x2 = x_nchw
        if (h2, w2d) != (h, width):
            x2 = x2[:, :, :h2, :w2d]
        th, wp, wop = _plan_pooled(h2, w2d, cin, cout, in_item, out_item,
                                   mxu_item, n, vmem_cap)
        if wp > w2d:                                  # zero-pad width for lane alignment
            x2 = jnp.pad(x2, ((0, 0), (0, 0), (0, 0), (0, wp - w2d)))
        tho = th // 2
        s, so = th * wp, tho * wop
        n_tiles = h2 // th
        x_flat = x2.reshape(n, cin, h2 * wp)          # contiguous reshape (free)

        pool_mat = _pool_matrix(th, wp, w2d, tho, wop, wo, mxu_dtype)
        kernel = _conv_bn_relu_pool_kernel
        in_specs = [
            pl.BlockSpec((1, cin, s), lambda i, r: (i, 0, r)),
            _const_spec((cout, cin), lambda i, r: (0, 0)),
            _const_spec((cout, 1), lambda i, r: (0, 0)),
            _const_spec((s, so), lambda i, r: (0, 0)),
        ]
        args = (x_flat, w_scaled, bias2, pool_mat)
        flops = 2 * n * n_tiles * (cout * cin * s + cout * s * so)
    else:
        l = h * width
        t, lp = _plan_flat(l, cin, cout, in_item, out_item, mxu_item, n, vmem_cap)
        x_flat = x_nchw.reshape(n, cin, l)            # contiguous reshape (free)
        if lp > l:
            x_flat = jnp.pad(x_flat, ((0, 0), (0, 0), (0, lp - l)))
        s = so = t
        n_tiles = lp // t
        kernel = _conv_bn_relu_kernel
        in_specs = [
            pl.BlockSpec((1, cin, s), lambda i, r: (i, 0, r)),
            _const_spec((cout, cin), lambda i, r: (0, 0)),
            _const_spec((cout, 1), lambda i, r: (0, 0)),
        ]
        args = (x_flat, w_scaled, bias2)
        flops = 2 * n * n_tiles * cout * cin * s

    est = _vmem_estimate(cin, cout, s, so, in_item, out_item, mxu_item, with_pooling)
    vmem_limit = int(min(vmem_cap - (2 << 20), max(2 * est + (8 << 20), 32 << 20)))
    bytes_accessed = (n * cin * n_tiles * s * in_item
                      + cout * cin * mxu_item
                      + n * cout * n_tiles * so * out_item)

    out_flat = pl.pallas_call(
        kernel,
        out_shape=jax.ShapeDtypeStruct((n, cout, n_tiles * so), in_dtype),
        grid_spec=pltpu.PrefetchScalarGridSpec(
            num_scalar_prefetch=0,
            grid=(n, n_tiles),
            in_specs=in_specs,
            out_specs=pl.BlockSpec((1, cout, so), lambda i, r: (i, 0, r)),
        ),
        compiler_params=pltpu.CompilerParams(
            dimension_semantics=("parallel", "parallel"),
            vmem_limit_bytes=vmem_limit),
        cost_estimate=pl.CostEstimate(
            flops=int(flops), transcendentals=0,
            bytes_accessed=int(bytes_accessed)),
    )(*args)

    if with_pooling:
        out = out_flat.reshape(n, cout, ho, wop)
        if wop > wo:
            out = out[:, :, :, :wo]                   # drop padded output columns
        return out
    out = out_flat[:, :, :h * width] if n_tiles * so > h * width else out_flat
    return out.reshape(n, cout, h, width)


# --------------------------------------------------------------------------- #
# Pure-JAX reference (eval-mode BN)
# --------------------------------------------------------------------------- #
def _reference(x_nchw, w, gamma, beta, run_mean, run_var,
               *, with_pooling=True, eps=1e-5):
    n, cin, h, width = x_nchw.shape
    w2 = jnp.reshape(w, (w.shape[0], cin)).astype(jnp.float32)
    cout = w2.shape[0]
    y = jnp.einsum("oc,nchw->nohw", w2, x_nchw.astype(jnp.float32))
    scale = gamma / jnp.sqrt(run_var + eps)
    bias = beta - run_mean * scale
    y = y * scale[None, :, None, None] + bias[None, :, None, None]
    y = jnp.maximum(y, 0.0)
    if with_pooling:
        ho, wo = h // 2, width // 2
        y = y[:, :, :2 * ho, :2 * wo].reshape(n, cout, ho, 2, wo, 2).mean(axis=(3, 5))
    return y.astype(x_nchw.dtype)


# --------------------------------------------------------------------------- #
# Self-test
# --------------------------------------------------------------------------- #
if __name__ == "__main__":
    key = jax.random.PRNGKey(0)

    def make(inp, oup, nb, hgt, wid, k):
        ks = jax.random.split(k, 6)
        x = jax.random.normal(ks[0], (nb, inp, hgt, wid), dtype=jnp.float32)
        wt = jax.random.normal(ks[1], (oup, inp), dtype=jnp.float32) * 0.1
        gamma = 1.0 + 0.1 * jax.random.normal(ks[2], (oup,), dtype=jnp.float32)
        beta = 0.1 * jax.random.normal(ks[3], (oup,), dtype=jnp.float32)
        mean = 0.1 * jax.random.normal(ks[4], (oup,), dtype=jnp.float32)
        var = jnp.abs(1.0 + 0.1 * jax.random.normal(ks[5], (oup,), dtype=jnp.float32))
        return x, wt, gamma, beta, mean, var

    k1, k2, k3 = jax.random.split(key, 3)

    # Case 1: aligned small shape (2, 4, 16, 16), both pooling modes,
    #         default bf16 MXU path (loose tol) + exact f32 path (tight tol).
    p1 = make(4, 8, 2, 16, 16, k1)
    for pool in (True, False):
        ref = _reference(*p1, with_pooling=pool)
        out = jax.block_until_ready(transition_block(*p1, with_pooling=pool))
        assert out.shape == ref.shape, (out.shape, ref.shape)
        assert jnp.allclose(out, ref, atol=3e-2, rtol=3e-2), "bf16 path mismatch"
        out32 = jax.block_until_ready(
            transition_block(*p1, with_pooling=pool, use_bf16_matmul=False))
        assert jnp.allclose(out32, ref, atol=1e-5, rtol=1e-5), "f32 path mismatch"

    # Case 2: non-aligned 28x28 at batch 1 -> exercises the padded / tiled pooled path.
    p2 = make(8, 16, 1, 28, 28, k2)
    ref2 = _reference(*p2, with_pooling=True)
    out2 = jax.block_until_ready(transition_block(*p2, with_pooling=True))
    assert out2.shape == ref2.shape, (out2.shape, ref2.shape)
    assert jnp.allclose(out2, ref2, atol=3e-2, rtol=3e-2), "padded pooled bf16 mismatch"
    out2_32 = jax.block_until_ready(
        transition_block(*p2, with_pooling=True, use_bf16_matmul=False))
    assert jnp.allclose(out2_32, ref2, atol=1e-5, rtol=1e-5), "padded pooled f32 mismatch"

    # Case 3: 40x40 at batch 1 -> padded pooled tiling + padded flat (no-pool) tiling.
    p3 = make(8, 16, 1, 40, 40, k3)
    for pool in (True, False):
        ref3 = _reference(*p3, with_pooling=pool)
        out3 = jax.block_until_ready(transition_block(*p3, with_pooling=pool))
        assert out3.shape == ref3.shape, (out3.shape, ref3.shape)
        assert jnp.allclose(out3, ref3, atol=3e-2, rtol=3e-2), "40x40 bf16 mismatch"
        out3_32 = jax.block_until_ready(
            transition_block(*p3, with_pooling=pool, use_bf16_matmul=False))
        assert jnp.allclose(out3_32, ref3, atol=1e-5, rtol=1e-5), "40x40 f32 mismatch"

    print("KERNEL_OK")
</pallas_src>

<mosaic_0001>
module attributes {stable_mosaic.version = 11 : i64} {
  func.func @_conv_bn_relu_pool_kernel(%arg0: i32, %arg1: i32, %arg2: memref<1x4x256xf32, #tpu.memory_space<vmem>>, %arg3: memref<8x4xbf16, #tpu.memory_space<vmem>>, %arg4: memref<8x1xf32, #tpu.memory_space<vmem>>, %arg5: memref<256x64xbf16, #tpu.memory_space<vmem>>, %arg6: memref<1x8x64xf32, #tpu.memory_space<vmem>>) attributes {dimension_semantics = [#tpu.dimension_semantics<parallel>, #tpu.dimension_semantics<parallel>], iteration_bounds = array<i64: 2, 1>, scalar_prefetch = 0 : i64, scratch_operands = 0 : i64, tpu.core_type = #tpu.core_type<tc>, window_params = [{transform_indices = @transform_0, window_bounds = array<i64: 1, 4, 256>}, {pipeline_mode = #tpu.pipeline_mode<synchronous>, transform_indices = @transform_1, window_bounds = array<i64: 8, 4>}, {pipeline_mode = #tpu.pipeline_mode<synchronous>, transform_indices = @transform_2, window_bounds = array<i64: 8, 1>}, {pipeline_mode = #tpu.pipeline_mode<synchronous>, transform_indices = @transform_3, window_bounds = array<i64: 256, 64>}, {transform_indices = @transform_4, window_bounds = array<i64: 1, 8, 64>}]} {
    %c0 = arith.constant 0 : index
    %c0_0 = arith.constant 0 : index
    %c0_1 = arith.constant 0 : index
    %0 = vector.load %arg2[%c0, %c0_0, %c0_1] : memref<1x4x256xf32, #tpu.memory_space<vmem>>, vector<1x4x256xf32>
    %1 = vector.shape_cast %0 : vector<1x4x256xf32> to vector<4x256xf32>
    %2 = arith.truncf %1 : vector<4x256xf32> to vector<4x256xbf16>
    %c0_2 = arith.constant 0 : index
    %c0_3 = arith.constant 0 : index
    %3 = vector.load %arg3[%c0_2, %c0_3] : memref<8x4xbf16, #tpu.memory_space<vmem>>, vector<8x4xbf16>
    %cst = arith.constant dense<0.000000e+00> : vector<8x256xf32>
    %4 = tpu.matmul %3, %2, %cst {dimension_numbers = #tpu.dot_dimension_numbers<[1], [0], [0], [1], [0, 0, 1, 1], [], []>} : vector<8x4xbf16>, vector<4x256xbf16>, vector<8x256xf32> -> vector<8x256xf32>
    %c0_4 = arith.constant 0 : index
    %c0_5 = arith.constant 0 : index
    %5 = vector.load %arg4[%c0_4, %c0_5] : memref<8x1xf32, #tpu.memory_space<vmem>>, vector<8x1xf32>
    %6 = vector.broadcast %5 : vector<8x1xf32> to vector<8x256xf32>
    %7 = arith.addf %4, %6 : vector<8x256xf32>
    %cst_6 = arith.constant 0.000000e+00 : f32
    %8 = vector.broadcast %cst_6 : f32 to vector<8x256xf32>
    %9 = arith.maximumf %7, %8 : vector<8x256xf32>
    %10 = arith.truncf %9 : vector<8x256xf32> to vector<8x256xbf16>
    %c0_7 = arith.constant 0 : index
    %c0_8 = arith.constant 0 : index
    %11 = vector.load %arg5[%c0_7, %c0_8] : memref<256x64xbf16, #tpu.memory_space<vmem>>, vector<256x64xbf16>
    %cst_9 = arith.constant dense<0.000000e+00> : vector<8x64xf32>
    %12 = tpu.matmul %10, %11, %cst_9 {dimension_numbers = #tpu.dot_dimension_numbers<[1], [0], [0], [1], [0, 0, 1, 1], [], []>} : vector<8x256xbf16>, vector<256x64xbf16>, vector<8x64xf32> -> vector<8x64xf32>
    %c0_10 = arith.constant 0 : index
    %c0_11 = arith.constant 0 : index
    %c0_12 = arith.constant 0 : index
    %13 = vector.load %arg6[%c0_10, %c0_11, %c0_12] : memref<1x8x64xf32, #tpu.memory_space<vmem>>, vector<1x8x64xf32>
    %14 = vector.shape_cast %13 : vector<1x8x64xf32> to vector<8x64xf32>
    %15 = vector.shape_cast %12 : vector<8x64xf32> to vector<1x8x64xf32>
    tpu.vector_store %arg6[%c0_10, %c0_11, %c0_12], %15 {strides = array<i32>} : memref<1x8x64xf32, #tpu.memory_space<vmem>>, vector<1x8x64xf32>,
    return
  }
  func.func @transform_0(%arg0: i32, %arg1: i32) -> (i32, i32, i32) {
    %c0_i32 = arith.constant 0 : i32
    %c0_i32_0 = arith.constant 0 : i32
    return %arg0, %c0_i32, %arg1 : i32, i32, i32
  }
  func.func @transform_1(%arg0: i32, %arg1: i32) -> (i32, i32) {
    %c0_i32 = arith.constant 0 : i32
    %c0_i32_0 = arith.constant 0 : i32
    %c0_i32_1 = arith.constant 0 : i32
    return %c0_i32, %c0_i32_0 : i32, i32
  }
  func.func @transform_2(%arg0: i32, %arg1: i32) -> (i32, i32) {
    %c0_i32 = arith.constant 0 : i32
    %c0_i32_0 = arith.constant 0 : i32
    %c0_i32_1 = arith.constant 0 : i32
    return %c0_i32, %c0_i32_0 : i32, i32
  }
  func.func @transform_3(%arg0: i32, %arg1: i32) -> (i32, i32) {
    %c0_i32 = arith.constant 0 : i32
    %c0_i32_0 = arith.constant 0 : i32
    %c0_i32_1 = arith.constant 0 : i32
    return %c0_i32, %c0_i32_0 : i32, i32
  }
  func.func @transform_4(%arg0: i32, %arg1: i32) -> (i32, i32, i32) {
    %c0_i32 = arith.constant 0 : i32
    %c0_i32_0 = arith.constant 0 : i32
    return %arg0, %c0_i32, %arg1 : i32, i32, i32
  }
}

</mosaic_0001>

<bundles_post_ra>
// kernel: tpu_custom_call.1
= control target key start
LH: loop header
LB: loop body
LE: loop exit
PB: predicated region body
PF: predicated region fallthrough
CT: control target
= control target key end

     0   :  { %9 = vsyncpa [#allocation3], 0  ;;  %s955_s0 = inlined_call_operand.vmem [shape: f32[2,4,256], index: 0, kind: input, shape index: {}]   ;;  %s956_s1 = inlined_call_operand.vmem [shape: bf16[8,4], index: 1, kind: input, shape index: {}]   ;;  %s957_s2 = inlined_call_operand.vmem [shape: f32[8,1], index: 2, kind: input, shape index: {}]   ;;  %s958_s3 = inlined_call_operand.vmem [shape: bf16[256,64], index: 3, kind: input, shape index: {}]   ;;  %s959_s4 = inlined_call_operand.hbm [shape: f32[2,8,64], index: 4, kind: output, shape index: {}]  }
   0x1   :  { %11 = vsyncpa [#allocation3 + $0x1], 0  ;;  %s789_s15 = smov 0   ;;  %s791_s16 = smov 0  }
   0x2   :  { %s793_s17 = smov 0   ;;  %s795_s18 = smov 0  }
   0x3   :  { %s797_s19 = smov 0   ;;  %s799_s20 = smov 0  }
   0x4 LB: > { %s555_s21 = sadd.s32 4294967295, %s760_s20   ;;  %s556_s22 = sadd.s32 4294967294, %s760_s20   ;;  %s760_s20 = sphi %s799_s20, %s17_s20   ;;  %s756_s19 = sphi %s797_s19, %s966_s19   ;;  %s752_s18 = sphi %s795_s18, %s965_s18   ;;  %s748_s17 = sphi %s793_s17, %s964_s17   ;;  %s744_s16 = sphi %s791_s16, %s963_s16   ;;  %s740_s15 = sphi %s789_s15, %s962_s15  }
   0x5   : > { %s29_s23 = sadd.s32 1, %s756_s19  ;;  %s129_s24 = sadd.s32 1, %s748_s17 }
   0x6   : > { %p31_p0 = scmp.ge.s32.totalorder %s29_s23, 2  ;;  %p139_p1 = scmp.ne.s32.totalorder %s748_s17, %s744_s16 }
   0x7   : > { %p140_p2 = scmp.eq.s32.totalorder %s555_s21, 1  ;;  %p145_p3 = scmp.ne.s32.totalorder %s744_s16, %s740_s15 }
   0x8   : > { %s968_s23 = smov (%p31_p0, %s29_s23), 0  ;;  %p146_p5 = scmp.eq.s32.totalorder %s556_s22, 1 }
   0x9   : > { %p829_p4 = por %p140_p2, %p139_p1  ;;  %s124_s26 = ssub.s32 %s756_s19, %s968_s23 }
   0xa   : > { %p559_p6 = scmp.ge.s32.totalorder %s760_s20, 1  ;;  %p127_p7 = scmp.eq.s32.totalorder %s124_s26, 0 }
   0xb   : > { %p836_p8 = por %p146_p5, %p145_p3  ;;  %p186_p9 = scmp.lt.s32.totalorder %s760_s20, 3 }
   0xc   : > { %s842_s28 = scalar_select %p127_p7, %s748_s17, %s129_s24  }
   0xd   : > { %p187_p10 = pnand %p559_p6, %p186_p9 }
   0xe   : > { %p217_p11 = scmp.lt.s32.totalorder (!%p187_p10), %s752_s18, 1  ;;  %v762_v0 = vmov (!%p187_p10), 0   ;;  %v234_v1 = vld [vmem:[%s957_s2] sm:$0xff] (!%p187_p10)  ;;  %v668_v4 = vld [vmem:[%s958_s3 + $0x48] sm:$0xff] (!%p187_p10)   ;;  %vm244_vm0 = vcmask (!%p187_p10), 1041408   ;;  %v670_v7 = vld [vmem:[%s958_s3 + $0x50] sm:$0xff] (!%p187_p10)  }
   0xf   : > { %190 = sbr.rel (%p187_p10) target bundleno = 484 (0x1e4), region = 36  ;;  %283 = vmatprep.mubr.bf16.mxu0 (!%p187_p10), %v762_v0  ;;  %664 = vset.pattern.permute.xlu0 (!%p187_p10), %v762_v0  ;;  %v666_v2 = vld [vmem:[%s958_s3 + $0x40] sm:$0xff] (!%p187_p10)   ;;  %v669_v5 = vld [vmem:[%s958_s3 + $0x8] sm:$0xff] (!%p187_p10)   ;;  %v671_v12 = vld [vmem:[%s958_s3 + $0x10] sm:$0xff] (!%p187_p10)   ;;  %vm240_vm1 = vcmask (!%p187_p10), 31744   ;;  %s213_s12 = sand.u32 (!%p187_p10), 1, %s744_s16  }
  0x10   : > { %237 = vperm.xlu0 (!%p187_p10), %664, %v234_v1   ;;  %v667_v3 = vld [vmem:[%s958_s3] sm:$0xff] (!%p187_p10)   ;;  %586 = vmatprep.subr.bf16.mxu1 (!%p187_p10), %v666_v2  ;;  %v672_v13 = vld [vmem:[%s958_s3 + $0x58] sm:$0xff] (!%p187_p10)   ;;  %v676_v18 = vld [vmem:[%s958_s3 + $0x68] sm:$0xff] (!%p187_p10)   ;;  %s560_s13 = sshll.u32 (!%p187_p10), %s213_s12, 3  ;;  %s582_s14 = sshll.u32 (!%p187_p10), %s752_s18, 7  ;;  %vm464_vm2 = vcmask (!%p187_p10), 523264  }
  0x11   : > { %587 = vmatpush3.bf16.msra.mxu1 (!%p187_p10), %v667_v3  ;;  %v233_v14 = vld [vmem:[%s956_s1] sm:$0xf] (!%p187_p10)  ;;  %v673_v15 = vld [vmem:[%s958_s3 + $0x18] sm:$0xff] (!%p187_p10)   ;;  %v677_v19 = vld [vmem:[%s958_s3 + $0x28] sm:$0xff] (!%p187_p10)   ;;  %s908_s29 = scalar_lea.hbm (!%p187_p10), %s959_s4, %s582_s14 }
  0x12   : > { %588 = vmatprep.subr.bf16.mxu1 (!%p187_p10), %v668_v4  ;;  %v674_v16 = vld [vmem:[%s958_s3 + $0x60] sm:$0xff] (!%p187_p10)   ;;  %v678_v20 = vld [vmem:[%s958_s3 + $0x70] sm:$0xff] (!%p187_p10)   ;;  %v680_v22 = vld [vmem:[%s958_s3 + $0x78] sm:$0xff] (!%p187_p10)  }
  0x13   : > { %v675_v17 = vld [vmem:[%s958_s3 + $0x20] sm:$0xff] (!%p187_p10)   ;;  %v679_v21 = vld [vmem:[%s958_s3 + $0x30] sm:$0xff] (!%p187_p10)   ;;  %v681_v23 = vld [vmem:[%s958_s3 + $0x38] sm:$0xff] (!%p187_p10)  }
  0x15   : > { %589 = vmatpush3.bf16.msra.mxu1 (!%p187_p10), %v669_v5 }
  0x16   : > { %s218_s5 = scalar_select %p217_p11, %s752_s18, 1  ;;  %590 = vmatprep.subr.bf16.mxu1 %v670_v7 }
  0x17   : > { %s467_s18 = scalar_lea.sflag [#allocation3], %s213_s12 }
  0x18   : > { %s585_s10 = sshll.u32 %s218_s5, 3  ;;  %s763_s5 = smov [#allocation2]  }
  0x19   : > { %s224_s21 = scalar_lea.vmem %s955_s0, %s585_s10  ;;  %591 = vmatpush3.bf16.msra.mxu1 %v671_v12  ;;  %s686_s6 = sshll.u32 %s763_s5, 4  ;;  %s687_s6 = int_to_ptr.vmem [resolvable:$false] %s686_s6 }
  0x1a   : > { %v227_v6 = vld [vmem:[%s224_s21] sm:$0xff]  ;;  %592 = vmatprep.subr.bf16.mxu1 %v672_v13  ;;  %s215_s21 = scalar_lea.vmem [#allocation2], %s560_s13  ;;  %s688_s7 = scalar_lea.vmem %s687_s6, 256 }
  0x1b   : > { %v229_v8 = vcombine.high %v227_v6, %v227_v6  ;;  %v231_v9 = vpack.c.bf16 %v227_v6, %v227_v6  ;;  %s481_s22 = sshll.u32 %s215_s21, 4  ;;  %s910_s22 = int_to_ptr.vmem [resolvable:$true] %s481_s22 }
  0x1c   : > { %s682_s30 = scalar_lea.vmem %s910_s22, 128  ;;  %p689_p1 = scmp.lt.s32.totalorder %s910_s22, %s687_s6 }
  0x1d   : > { %v232_v10 = vpack.c.bf16 %v229_v8, %v229_v8  ;;  %v246_v11 = vsel %vm244_vm0, %v231_v9, 0  ;;  %593 = vmatpush3.bf16.msra.mxu1 %v673_v15  ;;  %p683_p12 = scmp.ne.s32.totalorder %s910_s22, %s682_s30  ;;  %p690_p2 = scmp.lt.s32.totalorder %s688_s7, %s682_s30 }
  0x1e   : > { %594 = vmatprep.subr.bf16.mxu1 %v674_v16 }
  0x1f   : > { %563 = vmatprep.subr.msk.bf16.mxu0 %vm244_vm0, %v232_v10  ;;  %p684_p13 = pnand %p683_p12, %p829_p4  ;;  %p691_p3 = por %p690_p2, %p689_p1 }
  0x20   : > { %252 = vmatpush1.bf16.msra.mxu0 %v246_v11 }
  0x21   : > { %595 = vmatpush3.bf16.msra.mxu1 %v675_v17  ;;  %p685_p0 = pneg %p684_p13 }
  0x22   : > { %596 = vmatprep.subr.bf16.mxu1 %v676_v18 }
  0x23   : > { %564 = vmatmul.mubr.msk.bf16.vlgmr.msra.gmra.mrb[0].mxu0 %vm240_vm1, %v233_v14  ;;  %p692_p5 = pnand %p691_p3, %p685_p0 }
  0x25   : > { %597 = vmatpush3.bf16.msra.mxu1 %v677_v19 }
  0x26   : > { %598 = vmatprep.subr.bf16.mxu1 %v678_v20 }
  0x29   : > { %599 = vmatpush3.bf16.msra.mxu1 %v679_v21 }
  0x2a   : > { %600 = vmatprep.subr.bf16.mxu1 %v680_v22 }
  0x2d   : > { %601 = vmatpush3.bf16.msra.mxu1 %v681_v23 }
  0x8f   : > { %v238_v24 = vpop.permute.xlu0 %237 }
  0xf6   : > { %v285_v25 = vpop.f32.mrb[0].mxu0 }
  0xf7   : > { %v286_v26 = vadd.f32 %v285_v25, %v238_v24  ;;  %v287_v27 = vpop.f32.mrb[1].mxu0 }
  0xf8   : > { %v288_v28 = vadd.f32 %v287_v27, %v238_v24  ;;  %v289_v29 = vpop.f32.mrb[2].mxu0 }
  0xf9   : > { %v292_v30 = vmax.f32 %v286_v26, 0.0  ;;  %v290_v31 = vpop.f32.mrb[3].mxu0 }
  0xfa   : > { %v293_v32 = vmax.f32 %v288_v28, 0.0 }
  0xfb   : > { %v294_v34 = vpack.c.bf16 %v292_v30, %v292_v30 }
  0xfc   : > { %v295_v33 = vpack.c.bf16 %v293_v32, %v293_v32 }
  0xfe   : > { %456 = vmatprep.mubr.bf16.mxu1 %v295_v33 }
  0xff   : > { %457 = vmatmul.mubr.bf16.vlgmr.msra.gmra.mrb[0].mxu1 %v294_v34 }
 0x1d2   : > { %v602_v35 = vpop.f32.mrb[0].mxu1 }
 0x1d3   : > { %v603_v36 = vpop.f32.mrb[1].mxu1 }
 0x1d4   : > { %v604_v37 = vadd.f32 %v603_v36, %v602_v35  ;;  %v605_v38 = vpop.f32.mrb[2].mxu1 }
 0x1d5   : > { %v606_v39 = vpop.f32.mrb[3].mxu1 }
 0x1d6   : > { %465 = vst.msk [vmem:[%s215_s21] sm:$0xff] %vm464_vm2, %v604_v37 }
 0x1d7   : > { %695 = shalt.err (!%p692_p5)
}
 0x1d8   : > { %s696_s8 = scalar_lea.hbm %s908_s29, 128  ;;  %s700_s11 = scalar_lea.hbm %s959_s4, 256 }
 0x1d9   : > { %p697_p6 = scmp.ne.s32.totalorder %s908_s29, %s696_s8  ;;  %p701_p10 = scmp.lt.u32.totalorder %s908_s29, %s959_s4 }
 0x1da   : > { %p702_p11 = scmp.lt.u32.totalorder %s700_s11, %s696_s8  ;;  %p704_p13 = scmp.lt.u32.totalorder %s696_s8, %s908_s29 }
 0x1db   : > { %p698_p7 = pnand %p697_p6, %p829_p4 }
 0x1dc   : > { %p703_p12 = por %p702_p11, %p701_p10 }
 0x1dd   : > { %p699_p9 = pneg %p698_p7 }
 0x1de   : > { %p705_p0 = por %p704_p13, %p703_p12 }
 0x1e0   : > { %p706_p1 = pnand %p705_p0, %p699_p9 }
 0x1e2   : > { %709 = shalt.err (!%p706_p1)
}
 0x1e3   : > { %608 = dma.vmem_to_hbm [thread:$0]  (%p829_p4), %s910_s22, 128, %s908_s29, %s467_s18  }
 0x1e4 PF: > { %p614_p2 = scmp.ge.s32.totalorder %s760_s20, 2  ;;  %s493_s14 = sand.u32 1, %s740_s15  }
 0x1e5   : > { %s494_s21 = scalar_lea.sflag [#allocation3], %s493_s14 }
 0x1e6   : > { %p611_p3 = pnand %p614_p2, %p836_p8 }
 0x1e8   : > { %735 = dma.done.wait (!%p611_p3), %s494_s21, 128  }
 0x1e9   : > { %737 = vsyncadd (!%p611_p3), %s494_s21, 4294967168  ;;  %s17_s20 = sadd.s32 1, %s760_s20   ;;  %s962_s15 = smov %s744_s16 }
 0x1ea   : > { %p14_p5 = scmp.ge.s32.totalorder %s17_s20, 4   ;;  %s963_s16 = smov %s748_s17 }
 0x1eb   : > { %s964_s17 = smov %s842_s28  ;;  %s965_s18 = smov %s756_s19 }
 0x1ec   : > { %s966_s19 = smov %s968_s23  ;;  %16 = sbr.rel (!%p14_p5) target bundleno = 4 (0x4), region = 71 }
 0x1f3   :  { %499 = vsyncpa [#allocation3], 1 }
 0x1f4   :  { %501 = vsyncpa [#allocation3 + $0x1], 1 }

</bundles_post_ra>
